<compile_context>
chip_gen: v5e
topology: v5e:2x2
jax: 0.10.0
libtpu: 0.0.40
codegen_flags: <defaults>
</compile_context>

<pallas_src>
import jax
import jax.numpy as jnp
from jax.experimental import pallas as pl
from jax.experimental.pallas import tpu as pltpu

_LANE = 128


def _round_up(d, m):
    return pl.cdiv(d, m) * m


def _mlp_kernel(x_ref, w1_ref, b1_ref, w2_ref, b2_ref, w3_ref, b3_ref, o_ref):
    # bf16 operands into the MXU, f32 accumulation + f32 elementwise (VPU/EUP).
    x = x_ref[...].astype(jnp.bfloat16)                                   # (bt, obs_dim)
    h1 = jnp.dot(x, w1_ref[...], preferred_element_type=jnp.float32) + b1_ref[...]
    h1 = jnp.maximum(h1, 0.0)                                             # f32 ReLU
    h2 = jnp.dot(h1.astype(jnp.bfloat16), w2_ref[...],
                 preferred_element_type=jnp.float32) + b2_ref[...]
    h2 = jnp.maximum(h2, 0.0)
    out = jnp.dot(h2.astype(jnp.bfloat16), w3_ref[...],
                  preferred_element_type=jnp.float32) + b3_ref[...]
    o_ref[...] = out.astype(o_ref.dtype)                                  # lane-dense store


def pack_params(params):
    """One-time prep: zero-pad the OUTPUT feature dim of every layer to a multiple
    of 128 lanes and store matmul weights in bf16 at rest (biases stay f32 for the
    f32 bias-add).  The input dim of layer 1 (obs_dim) is left unpadded so the
    per-call obs tensor needs no padding/copy; zero-padded hidden columns feed
    zero-padded rows of the next weight, so results are exact, and padded output
    columns are sliced off in the wrapper."""
    w1, b1 = params["w1"], params["b1"]
    w2, b2 = params["w2"], params["b2"]
    w3, b3 = params["w3"], params["b3"]
    obs_dim, hidden_dim = w1.shape
    skill_dim = w3.shape[1]
    d_hid = _round_up(hidden_dim, _LANE)
    d_out = _round_up(skill_dim, _LANE)

    def pad2(a, rows, cols):
        return jnp.pad(a, ((0, rows - a.shape[0]), (0, cols - a.shape[1])))

    return dict(
        w1=pad2(w1, obs_dim, d_hid).astype(jnp.bfloat16),   # (obs_dim, d_hid)
        b1=pad2(b1, 1, d_hid).astype(jnp.float32),
        w2=pad2(w2, d_hid, d_hid).astype(jnp.bfloat16),
        b2=pad2(b2, 1, d_hid).astype(jnp.float32),
        w3=pad2(w3, d_hid, d_out).astype(jnp.bfloat16),
        b3=pad2(b3, 1, d_out).astype(jnp.float32),
        skill_dim=skill_dim,
        obs_dim=obs_dim,
    )


def discriminator_forward(obs, packed, *, batch_tile=256):
    """obs: (B, obs_dim) float32. packed: output of pack_params().
    Note: for genuinely tiny batches (a handful of rows) the pure-JAX reference
    path is cheaper than a custom-call launch; this kernel targets training-sized
    batches. The test below still exercises the kernel."""
    B, obs_dim = obs.shape
    assert obs_dim == packed["obs_dim"]
    assert batch_tile % 8 == 0, "batch_tile must be a multiple of 8 sublanes"

    w1, b1 = packed["w1"], packed["b1"]
    w2, b2 = packed["w2"], packed["b2"]
    w3, b3 = packed["w3"], packed["b3"]
    d_hid = w1.shape[1]
    d_out = w3.shape[1]
    skill_dim = packed["skill_dim"]

    # Shrink the tile for small batches (avoid computing padded rows), then pad
    # the batch only if it is not already a whole number of tiles.
    batch_tile = min(batch_tile, int(_round_up(B, 8)))
    n_tiles = pl.cdiv(B, batch_tile)
    b_pad = n_tiles * batch_tile
    x = obs if b_pad == B else jnp.pad(obs, ((0, b_pad - B), (0, 0)))

    out = pl.pallas_call(
        _mlp_kernel,
        out_shape=jax.ShapeDtypeStruct((b_pad, d_out), jnp.float32),
        grid=(n_tiles,),
        in_specs=[
            # obs tile: minor dim == full obs_dim (allowed; no 128-padding needed)
            pl.BlockSpec((batch_tile, obs_dim), lambda i: (i, 0)),
            pl.BlockSpec((obs_dim, d_hid), lambda i: (0, 0)),    # w1 (VMEM-resident)
            pl.BlockSpec((1, d_hid), lambda i: (0, 0)),          # b1
            pl.BlockSpec((d_hid, d_hid), lambda i: (0, 0)),      # w2
            pl.BlockSpec((1, d_hid), lambda i: (0, 0)),          # b2
            pl.BlockSpec((d_hid, d_out), lambda i: (0, 0)),      # w3
            pl.BlockSpec((1, d_out), lambda i: (0, 0)),          # b3
        ],
        out_specs=pl.BlockSpec((batch_tile, d_out), lambda i: (i, 0)),
        compiler_params=pltpu.CompilerParams(
            dimension_semantics=("parallel",),
        ),
    )(x, w1, b1, w2, b2, w3, b3)

    return out[:B, :skill_dim]


def init_params(key, obs_dim, skill_dim, hidden_dim):
    """Deterministic synthetic init (stand-in for utils.weight_init / orthogonal)."""
    # TODO(synk): original uses utils.weight_init (orthogonal); uniform fan-in init used here.
    k1, k2, k3 = jax.random.split(key, 3)

    def lin(k, fan_in, fan_out):
        scale = 1.0 / jnp.sqrt(fan_in)
        w = jax.random.uniform(k, (fan_in, fan_out), jnp.float32, -scale, scale)
        b = jnp.zeros((1, fan_out), jnp.float32)
        return w, b

    w1, b1 = lin(k1, obs_dim, hidden_dim)
    w2, b2 = lin(k2, hidden_dim, hidden_dim)
    w3, b3 = lin(k3, hidden_dim, skill_dim)
    return dict(w1=w1, b1=b1, w2=w2, b2=b2, w3=w3, b3=b3)


def _reference(obs, p):
    h1 = jnp.maximum(obs @ p["w1"] + p["b1"], 0.0)
    h2 = jnp.maximum(h1 @ p["w2"] + p["b2"], 0.0)
    return h2 @ p["w3"] + p["b3"]


if __name__ == "__main__":
    obs_dim, skill_dim, hidden_dim = 24, 16, 32
    batch = 512  # 2 tiles of 256 -> >=2 parallel grid steps (both v7x TensorCores used)

    key = jax.random.PRNGKey(0)
    k_obs, k_par = jax.random.split(key)
    obs = jax.random.normal(k_obs, (batch, obs_dim), jnp.float32)
    params = init_params(k_par, obs_dim, skill_dim, hidden_dim)
    packed = pack_params(params)

    skill_pred = discriminator_forward(obs, packed)
    skill_pred = jax.block_until_ready(skill_pred)

    ref = _reference(obs, params)
    assert skill_pred.shape == (batch, skill_dim)
    # bf16 matmul operands with f32 accumulation -> loose-but-safe tolerance vs f32 ref.
    assert jnp.allclose(skill_pred, ref, atol=5e-2, rtol=5e-2), (
        f"max abs err {float(jnp.max(jnp.abs(skill_pred - ref)))}"
    )

    # Also exercise a non-tile-multiple, small batch (tile shrink + batch pad path).
    obs_small = obs[:37]
    ref_small = _reference(obs_small, params)
    pred_small = jax.block_until_ready(discriminator_forward(obs_small, packed))
    assert pred_small.shape == (37, skill_dim)
    assert jnp.allclose(pred_small, ref_small, atol=5e-2, rtol=5e-2)

    print("KERNEL_OK")
</pallas_src>

<mosaic_0001>
module attributes {stable_mosaic.version = 11 : i64} {
  func.func @_mlp_kernel(%arg0: i32, %arg1: memref<256x24xf32, #tpu.memory_space<vmem>>, %arg2: memref<24x128xbf16, #tpu.memory_space<vmem>>, %arg3: memref<1x128xf32, #tpu.memory_space<vmem>>, %arg4: memref<128x128xbf16, #tpu.memory_space<vmem>>, %arg5: memref<1x128xf32, #tpu.memory_space<vmem>>, %arg6: memref<128x128xbf16, #tpu.memory_space<vmem>>, %arg7: memref<1x128xf32, #tpu.memory_space<vmem>>, %arg8: memref<256x128xf32, #tpu.memory_space<vmem>>) attributes {dimension_semantics = [#tpu.dimension_semantics<parallel>], iteration_bounds = array<i64: 2>, scalar_prefetch = 0 : i64, scratch_operands = 0 : i64, tpu.core_type = #tpu.core_type<tc>, window_params = [{transform_indices = @transform_0, window_bounds = array<i64: 256, 24>}, {pipeline_mode = #tpu.pipeline_mode<synchronous>, transform_indices = @transform_1, window_bounds = array<i64: 24, 128>}, {pipeline_mode = #tpu.pipeline_mode<synchronous>, transform_indices = @transform_2, window_bounds = array<i64: 1, 128>}, {pipeline_mode = #tpu.pipeline_mode<synchronous>, transform_indices = @transform_3, window_bounds = array<i64: 128, 128>}, {pipeline_mode = #tpu.pipeline_mode<synchronous>, transform_indices = @transform_4, window_bounds = array<i64: 1, 128>}, {pipeline_mode = #tpu.pipeline_mode<synchronous>, transform_indices = @transform_5, window_bounds = array<i64: 128, 128>}, {pipeline_mode = #tpu.pipeline_mode<synchronous>, transform_indices = @transform_6, window_bounds = array<i64: 1, 128>}, {transform_indices = @transform_7, window_bounds = array<i64: 256, 128>}]} {
    %c0 = arith.constant 0 : index
    %c0_0 = arith.constant 0 : index
    %0 = vector.load %arg1[%c0, %c0_0] : memref<256x24xf32, #tpu.memory_space<vmem>>, vector<256x24xf32>
    %1 = arith.truncf %0 : vector<256x24xf32> to vector<256x24xbf16>
    %c0_1 = arith.constant 0 : index
    %c0_2 = arith.constant 0 : index
    %2 = vector.load %arg2[%c0_1, %c0_2] : memref<24x128xbf16, #tpu.memory_space<vmem>>, vector<24x128xbf16>
    %cst = arith.constant dense<0.000000e+00> : vector<256x128xf32>
    %3 = tpu.matmul %1, %2, %cst {dimension_numbers = #tpu.dot_dimension_numbers<[1], [0], [0], [1], [0, 0, 1, 1], [], []>} : vector<256x24xbf16>, vector<24x128xbf16>, vector<256x128xf32> -> vector<256x128xf32>
    %c0_3 = arith.constant 0 : index
    %c0_4 = arith.constant 0 : index
    %4 = vector.load %arg3[%c0_3, %c0_4] : memref<1x128xf32, #tpu.memory_space<vmem>>, vector<1x128xf32>
    %5 = vector.broadcast %4 : vector<1x128xf32> to vector<256x128xf32>
    %6 = arith.addf %3, %5 : vector<256x128xf32>
    %cst_5 = arith.constant 0.000000e+00 : f32
    %7 = vector.broadcast %cst_5 : f32 to vector<256x128xf32>
    %8 = arith.maximumf %6, %7 : vector<256x128xf32>
    %9 = arith.truncf %8 : vector<256x128xf32> to vector<256x128xbf16>
    %c0_6 = arith.constant 0 : index
    %c0_7 = arith.constant 0 : index
    %10 = vector.load %arg4[%c0_6, %c0_7] : memref<128x128xbf16, #tpu.memory_space<vmem>>, vector<128x128xbf16>
    %cst_8 = arith.constant dense<0.000000e+00> : vector<256x128xf32>
    %11 = tpu.matmul %9, %10, %cst_8 {dimension_numbers = #tpu.dot_dimension_numbers<[1], [0], [0], [1], [0, 0, 1, 1], [], []>} : vector<256x128xbf16>, vector<128x128xbf16>, vector<256x128xf32> -> vector<256x128xf32>
    %c0_9 = arith.constant 0 : index
    %c0_10 = arith.constant 0 : index
    %12 = vector.load %arg5[%c0_9, %c0_10] : memref<1x128xf32, #tpu.memory_space<vmem>>, vector<1x128xf32>
    %13 = vector.broadcast %12 : vector<1x128xf32> to vector<256x128xf32>
    %14 = arith.addf %11, %13 : vector<256x128xf32>
    %cst_11 = arith.constant 0.000000e+00 : f32
    %15 = vector.broadcast %cst_11 : f32 to vector<256x128xf32>
    %16 = arith.maximumf %14, %15 : vector<256x128xf32>
    %17 = arith.truncf %16 : vector<256x128xf32> to vector<256x128xbf16>
    %c0_12 = arith.constant 0 : index
    %c0_13 = arith.constant 0 : index
    %18 = vector.load %arg6[%c0_12, %c0_13] : memref<128x128xbf16, #tpu.memory_space<vmem>>, vector<128x128xbf16>
    %cst_14 = arith.constant dense<0.000000e+00> : vector<256x128xf32>
    %19 = tpu.matmul %17, %18, %cst_14 {dimension_numbers = #tpu.dot_dimension_numbers<[1], [0], [0], [1], [0, 0, 1, 1], [], []>} : vector<256x128xbf16>, vector<128x128xbf16>, vector<256x128xf32> -> vector<256x128xf32>
    %c0_15 = arith.constant 0 : index
    %c0_16 = arith.constant 0 : index
    %20 = vector.load %arg7[%c0_15, %c0_16] : memref<1x128xf32, #tpu.memory_space<vmem>>, vector<1x128xf32>
    %21 = vector.broadcast %20 : vector<1x128xf32> to vector<256x128xf32>
    %22 = arith.addf %19, %21 : vector<256x128xf32>
    %c0_17 = arith.constant 0 : index
    %c0_18 = arith.constant 0 : index
    %23 = vector.load %arg8[%c0_17, %c0_18] : memref<256x128xf32, #tpu.memory_space<vmem>>, vector<256x128xf32>
    tpu.vector_store %arg8[%c0_17, %c0_18], %22 {strides = array<i32>} : memref<256x128xf32, #tpu.memory_space<vmem>>, vector<256x128xf32>,
    return
  }
  func.func @transform_0(%arg0: i32) -> (i32, i32) {
    %c0_i32 = arith.constant 0 : i32
    %c0_i32_0 = arith.constant 0 : i32
    return %arg0, %c0_i32 : i32, i32
  }
  func.func @transform_1(%arg0: i32) -> (i32, i32) {
    %c0_i32 = arith.constant 0 : i32
    %c0_i32_0 = arith.constant 0 : i32
    %c0_i32_1 = arith.constant 0 : i32
    return %c0_i32, %c0_i32_0 : i32, i32
  }
  func.func @transform_2(%arg0: i32) -> (i32, i32) {
    %c0_i32 = arith.constant 0 : i32
    %c0_i32_0 = arith.constant 0 : i32
    %c0_i32_1 = arith.constant 0 : i32
    return %c0_i32, %c0_i32_0 : i32, i32
  }
  func.func @transform_3(%arg0: i32) -> (i32, i32) {
    %c0_i32 = arith.constant 0 : i32
    %c0_i32_0 = arith.constant 0 : i32
    %c0_i32_1 = arith.constant 0 : i32
    return %c0_i32, %c0_i32_0 : i32, i32
  }
  func.func @transform_4(%arg0: i32) -> (i32, i32) {
    %c0_i32 = arith.constant 0 : i32
    %c0_i32_0 = arith.constant 0 : i32
    %c0_i32_1 = arith.constant 0 : i32
    return %c0_i32, %c0_i32_0 : i32, i32
  }
  func.func @transform_5(%arg0: i32) -> (i32, i32) {
    %c0_i32 = arith.constant 0 : i32
    %c0_i32_0 = arith.constant 0 : i32
    %c0_i32_1 = arith.constant 0 : i32
    return %c0_i32, %c0_i32_0 : i32, i32
  }
  func.func @transform_6(%arg0: i32) -> (i32, i32) {
    %c0_i32 = arith.constant 0 : i32
    %c0_i32_0 = arith.constant 0 : i32
    %c0_i32_1 = arith.constant 0 : i32
    return %c0_i32, %c0_i32_0 : i32, i32
  }
  func.func @transform_7(%arg0: i32) -> (i32, i32) {
    %c0_i32 = arith.constant 0 : i32
    %c0_i32_0 = arith.constant 0 : i32
    return %arg0, %c0_i32 : i32, i32
  }
}

</mosaic_0001>

<bundles_post_ra>
// kernel: tpu_custom_call.1
= control target key start
LH: loop header
LB: loop body
LE: loop exit
PB: predicated region body
PF: predicated region fallthrough
CT: control target
= control target key end

     0   :  { %12 = vsyncpa [#allocation3], 0  ;;  %s1627_s0 = inlined_call_operand.vmem [shape: f32[512,24], index: 0, kind: input, shape index: {}]   ;;  %s1628_s1 = inlined_call_operand.vmem [shape: bf16[24,128], index: 1, kind: input, shape index: {}]   ;;  %s1629_s2 = inlined_call_operand.vmem [shape: f32[1,128], index: 2, kind: input, shape index: {}]   ;;  %s1630_s3 = inlined_call_operand.vmem [shape: bf16[128,128], index: 3, kind: input, shape index: {}]   ;;  %s1631_s4 = inlined_call_operand.vmem [shape: f32[1,128], index: 4, kind: input, shape index: {}]   ;;  %s1632_s5 = inlined_call_operand.vmem [shape: bf16[128,128], index: 5, kind: input, shape index: {}]   ;;  %s1633_s6 = inlined_call_operand.vmem [shape: f32[1,128], index: 6, kind: input, shape index: {}]   ;;  %s1634_s7 = inlined_call_operand.hbm [shape: f32[512,128], index: 7, kind: output, shape index: {}]  }
   0x1   :  { %14 = vsyncpa [#allocation3 + $0x1], 0  ;;  %s1289_s24 = smov 0   ;;  %s1291_s25 = smov 0  }
   0x2   :  { %s1293_s26 = smov 0   ;;  %s1295_s27 = smov 0  }
   0x3 LB: > { %s1310_s28 = sadd.s32 4294967295, %s1245_s27   ;;  %s1007_s29 = sadd.s32 4294967294, %s1245_s27   ;;  %s1245_s27 = sphi %s1295_s27, %s1640_s27   ;;  %s1241_s26 = sphi %s1293_s26, %s1639_s26   ;;  %s1237_s25 = sphi %s1291_s25, %s1638_s25   ;;  %s1233_s24 = sphi %s1289_s24, %s1637_s24  }
   0x4   : > { %s1314_s30 = sadd.s32 1, %s1245_s27   ;;  %s179_s8 = sadd.s32 1, %s1241_s26 }
   0x5   : > { %s176_s9 = ssub.s32 %s1245_s27, %s1314_s30  ;;  %p189_p0 = scmp.ne.s32.totalorder %s1241_s26, %s1237_s25 }
   0x6   : > { %p177_p1 = scmp.eq.s32.totalorder %s176_s9, 0  ;;  %p190_p2 = scmp.eq.s32.totalorder %s1310_s28, 1 }
   0x7   : > { %p195_p3 = scmp.ne.s32.totalorder %s1237_s25, %s1233_s24  ;;  %p196_p4 = scmp.eq.s32.totalorder %s1007_s29, 1 }
   0x8   : > { %s1325_s10 = scalar_select %p177_p1, %s1241_s26, %s179_s8  }
   0x9   : > { %p1327_p5 = por %p190_p2, %p189_p0  ;;  %p1331_p6 = por %p196_p4, %p195_p3 }
   0xa   : > { %p1010_p7 = scmp.ge.s32.totalorder %s1245_s27, 1  ;;  %p241_p8 = scmp.lt.s32.totalorder %s1245_s27, 3 }
   0xc   : > { %p242_p9 = pnand %p1010_p7, %p241_p8 }
   0xd   : > { %s1012_s15 = sshll.u32 (!%p242_p9), %s1310_s28, 5  ;;  %s1120_s22 = sshll.u32 (!%p242_p9), %s1310_s28, 8 }
   0xe   : > { %245 = sbr.rel (%p242_p9) target bundleno = 704 (0x2c0), region = 48  ;;  %p274_p10 = scmp.lt.s32.totalorder (!%p242_p9), %s1012_s15, 63 }
   0xf   : > { %s941_s8 = scalar_lea.hbm (!%p242_p9), %s1634_s7, %s1120_s22  ;;  %s1203_s18 = scalar_lea.hbm (!%p242_p9), %s1634_s7, 512 }
  0x13   : > { %v331_v0 = vld [vmem:[%s1628_s1 + $0x8] sm:$0xf]  ;;  %vm394_vm0 = vcmask 1043456   ;;  %s1642_s15 = smov (!%p274_p10, %s1012_s15), 63  ;;  %v1103_v4 = vld [vmem:[%s1628_s1] sm:$0xff]  ;;  %vm345_vm1 = vcmask 195584  }
  0x14   : > { %v341_v1 = vunpack.c.l.b16 %v331_v0  ;;  %s1013_s16 = sshll.u32 %s1642_s15, 3  ;;  %v1111_v20 = vld [vmem:[%s1630_s3 + $0x38] sm:$0xff]  ;;  %v1110_v24 = vld [vmem:[%s1630_s3 + $0x30] sm:$0xff]  ;;  %v1109_v25 = vld [vmem:[%s1630_s3 + $0x28] sm:$0xff] }
  0x15   : > { %s1347_s21 = scalar_lea.vmem %s1627_s0, %s1013_s16  ;;  %603 = vmatpush.bf16.msra.mxu1 %v1111_v20  ;;  %v1108_v26 = vld [vmem:[%s1630_s3 + $0x20] sm:$0xff]  ;;  %v1107_v29 = vld [vmem:[%s1630_s3 + $0x18] sm:$0xff]  ;;  %v1106_v31 = vld [vmem:[%s1630_s3 + $0x10] sm:$0xff]  ;;  %s270_s16 = sand.u32 1, %s1237_s25  }
  0x16   : > { %v343_v2 = vpack.c.b16 %v341_v1, %v341_v1  ;;  %v281_v5 = vld [vmem:[%s1347_s21] sm:$0xff]  ;;  %v282_v6 = vld [vmem:[%s1347_s21 + $0x8] sm:$0xff]  ;;  %v283_v8 = vld [vmem:[%s1347_s21 + $0x10] sm:$0xff]  ;;  %s1011_s17 = sshll.u32 %s270_s16, 8  ;;  %s930_s13 = scalar_lea.sflag [#allocation3], %s270_s16 }
  0x17   : > { %v313_v7 = vpack.c.bf16 %v282_v6, %v281_v5  ;;  %v284_v9 = vld [vmem:[%s1347_s21 + $0x18] sm:$0xff]  ;;  %v285_v11 = vld [vmem:[%s1347_s21 + $0x20] sm:$0xff]  ;;  %v286_v12 = vld [vmem:[%s1347_s21 + $0x28] sm:$0xff]  ;;  %s1514_s20 = scalar_lea.vmem [#allocation2], %s1011_s17 }
  0x18   : > { %v396_v3 = vsel %vm394_vm0, %v343_v2, 0  ;;  %v314_v10 = vpack.c.bf16 %v284_v9, %v283_v8  ;;  %v315_v13 = vpack.c.bf16 %v286_v12, %v285_v11  ;;  %v287_v14 = vld [vmem:[%s1347_s21 + $0x30] sm:$0xff]  ;;  %v288_v15 = vld [vmem:[%s1347_s21 + $0x38] sm:$0xff]  ;;  %v289_v17 = vld [vmem:[%s1347_s21 + $0x40] sm:$0xff]  ;;  %s942_s9 = sshll.u32 %s1514_s20, 4  ;;  %s943_s9 = int_to_ptr.vmem [resolvable:$true] %s942_s9 }
  0x19   : > { %404 = vmatpush.bf16.msra.mxu0 %v396_v3  ;;  %1121 = vmatpush.bf16.msra.mxu3 %v396_v3  ;;  %v316_v16 = vpack.c.bf16 %v288_v15, %v287_v14  ;;  %v290_v18 = vld [vmem:[%s1347_s21 + $0x48] sm:$0xff]  ;;  %v291_v21 = vld [vmem:[%s1347_s21 + $0x50] sm:$0xff]  ;;  %v292_v22 = vld [vmem:[%s1347_s21 + $0x58] sm:$0xff] }
  0x1a   : > { %v317_v19 = vpack.c.bf16 %v290_v18, %v289_v17  ;;  %v318_v23 = vpack.c.bf16 %v292_v22, %v291_v21  ;;  %604 = vmatpush.bf16.msra.mxu1 %v1110_v24  ;;  %v293_v27 = vld [vmem:[%s1347_s21 + $0x60] sm:$0xff]  ;;  %v294_v28 = vld [vmem:[%s1347_s21 + $0x68] sm:$0xff]  ;;  %v295_v34 = vld [vmem:[%s1347_s21 + $0x70] sm:$0xff] }
  0x1b   : > { %v319_v30 = vpack.c.bf16 %v294_v28, %v293_v27  ;;  %v1105_v32 = vld [vmem:[%s1630_s3 + $0x8] sm:$0xff]  ;;  %v1104_v33 = vld [vmem:[%s1630_s3] sm:$0xff]  ;;  %v296_v35 = vld [vmem:[%s1347_s21 + $0x78] sm:$0xff] }
  0x1c   : > { %v320_v36 = vpack.c.bf16 %v296_v35, %v295_v34  ;;  %v297_v37 = vld [vmem:[%s1347_s21 + $0x80] sm:$0xff]  ;;  %v298_v38 = vld [vmem:[%s1347_s21 + $0x88] sm:$0xff]  ;;  %v299_v47 = vld [vmem:[%s1347_s21 + $0x90] sm:$0xff] }
  0x1d   : > { %405 = vmatpush.bf16.msra.mxu0 %v1103_v4  ;;  %1122 = vmatpush.bf16.msra.mxu3 %v1103_v4  ;;  %v321_v39 = vpack.c.bf16 %v298_v38, %v297_v37  ;;  %v1402_v41 = vld [vmem:[%s1629_s2] ss:$0 sm:$0xff]  ;;  %v300_v48 = vld [vmem:[%s1347_s21 + $0x98] sm:$0xff]  ;;  %v302_v58 = vld [vmem:[%s1347_s21 + $0xa8] sm:$0xff] }
  0x1e   : > { %605 = vmatpush.bf16.msra.mxu1 %v1109_v25  ;;  %v322_v50 = vpack.c.bf16 %v300_v48, %v299_v47  ;;  %v301_v57 = vld [vmem:[%s1347_s21 + $0xa0] sm:$0xff]  ;;  %v307_v62 = vld [vmem:[%s1347_s21 + $0xd0] sm:$0xff]  ;;  %v308_v63 = vld [vmem:[%s1347_s21 + $0xd8] sm:$0xff] }
  0x1f   : > { %v323_v60 = vpack.c.bf16 %v302_v58, %v301_v57  ;;  %v326_v0 = vpack.c.bf16 %v308_v63, %v307_v62  ;;  %v303_v6 = vld [vmem:[%s1347_s21 + $0xb0] sm:$0xff]  ;;  %v309_v11 = vld [vmem:[%s1347_s21 + $0xe0] sm:$0xff]  ;;  %v310_v12 = vld [vmem:[%s1347_s21 + $0xe8] sm:$0xff] }
  0x20   : > { %1018 = vmatmul.msk.bf16.vlgmr.msra.gmra.mxu0 %vm345_vm1, %v313_v7  ;;  %v304_v7 = vld [vmem:[%s1347_s21 + $0xb8] sm:$0xff] }
  0x21   : > { %1123 = vmatpush.bf16.msrb.mxu3 %v1111_v20  ;;  %v324_v9 = vpack.c.bf16 %v304_v7, %v303_v6  ;;  %v306_v20 = vld [vmem:[%s1347_s21 + $0xc8] sm:$0xff]  ;;  %v1119_v37 = vld [vmem:[%s1632_s5 + $0x38] sm:$0xff]  ;;  %v1471_v7 = vld [vmem:[%s1631_s4] ss:$0 sm:$0xff] }
  0x22   : > { %606 = vmatpush.bf16.msra.mxu1 %v1108_v26  ;;  %1031 = vmatmul.msk.bf16.vlgmr.msra.gmra.mxu3 %vm345_vm1, %v326_v0 }
  0x23   : > { %808 = vmatpush.bf16.msra.mxu2 %v1119_v37 }
  0x25   : > { %1124 = vmatpush.bf16.msrb.mxu3 %v1110_v24  ;;  %v311_v24 = vld [vmem:[%s1347_s21 + $0xf0] sm:$0xff] }
  0x26   : > { %607 = vmatpush.bf16.msra.mxu1 %v1107_v29 }
  0x29   : > { %1125 = vmatpush.bf16.msrb.mxu3 %v1109_v25  ;;  %v312_v25 = vld [vmem:[%s1347_s21 + $0xf8] sm:$0xff] }
  0x2a   : > { %608 = vmatpush.bf16.msra.mxu1 %v1106_v31 }
  0x2d   : > { %1126 = vmatpush.bf16.msrb.mxu3 %v1108_v26  ;;  %v328_v26 = vpack.c.bf16 %v312_v25, %v311_v24 }
  0x2e   : > { %609 = vmatpush.bf16.msra.mxu1 %v1105_v32 }
  0x30   : > { %1019 = vmatmul.msk.bf16.gmra.mxu0 %vm345_vm1, %v314_v10 }
  0x31   : > { %1127 = vmatpush.bf16.msrb.mxu3 %v1107_v29 }
  0x32   : > { %610 = vmatpush.bf16.msra.mxu1 %v1104_v33 }
  0x35   : > { %1128 = vmatpush.bf16.msrb.mxu3 %v1106_v31 }
  0x39   : > { %1129 = vmatpush.bf16.msrb.mxu3 %v1105_v32 }
  0x3d   : > { %1130 = vmatpush.bf16.msrb.mxu3 %v1104_v33 }
  0x40   : > { %1020 = vmatmul.msk.bf16.gmra.mxu0 %vm345_vm1, %v315_v13  ;;  %v327_v13 = vpack.c.bf16 %v310_v12, %v309_v11 }
  0x41   : > { %1131 = vmatpush.bf16.msra.mxu3 %v1119_v37 }
  0x42   : > { %1032 = vmatmul.msk.bf16.gmra.mxu3 %vm345_vm1, %v327_v13 }
  0x50   : > { %1021 = vmatmul.msk.bf16.gmra.mxu0 %vm345_vm1, %v316_v16 }
  0x52   : > { %1033 = vmatmul.msk.bf16.gmra.mxu3 %vm345_vm1, %v328_v26 }
  0x60   : > { %1022 = vmatmul.msk.bf16.gmra.mxu0 %vm345_vm1, %v317_v19  ;;  %v305_v19 = vld [vmem:[%s1347_s21 + $0xc0] sm:$0xff]  ;;  %s944_s21 = sshll.u32 %s941_s8, 4  ;;  %s945_s21 = int_to_ptr.hbm [resolvable:$true] %s944_s21 }
  0x61   : > { %v325_v22 = vpack.c.bf16 %v306_v20, %v305_v19  ;;  %s1197_s28 = sshra.s32 %s945_s21, 4  ;;  %s1198_s28 = int_to_ptr.hbm [resolvable:$true] %s1197_s28 }
  0x62   : > { %s1199_s14 = scalar_lea.hbm %s1198_s28, 256  ;;  %p1204_p0 = scmp.lt.s32.totalorder %s1198_s28, %s1634_s7 }
  0x63   : > { %p1200_p11 = scmp.ne.s32.totalorder %s1198_s28, %s1199_s14  ;;  %p1205_p1 = scmp.lt.s32.totalorder %s1203_s18, %s1199_s14 }
  0x65   : > { %p1201_p12 = pnand %p1200_p11, %p1327_p5  ;;  %p1206_p2 = por %p1205_p1, %p1204_p0 }
  0x67   : > { %p1202_p13 = pneg %p1201_p12 }
  0x69   : > { %p1207_p3 = pnand %p1206_p2, %p1202_p13 }
  0x70   : > { %1023 = vmatmul.msk.bf16.gmra.mxu0 %vm345_vm1, %v318_v23 }
  0x80   : > { %1024 = vmatmul.msk.bf16.gmra.mxu0 %vm345_vm1, %v319_v30 }
  0x90   : > { %1025 = vmatmul.msk.bf16.gmra.mxu0 %vm345_vm1, %v320_v36 }
  0x9d   : > { %v407_v40 = vpop.f32.mrf.mxu0 }
  0x9e   : > { %v408_v42 = vadd.f32 %v1402_v41, %v407_v40 }
  0xa0   : > { %1026 = vmatmul.msk.bf16.gmra.mxu0 %vm345_vm1, %v321_v39  ;;  %v487_v45 = vmax.f32 %v408_v42, 0.0  ;;  %v1118_v42 = vld [vmem:[%s1632_s5 + $0x30] sm:$0xff] }
  0xa1   : > { %809 = vmatpush.bf16.msra.mxu2 %v1118_v42  ;;  %1132 = vmatpush.bf16.msra.mxu3 %v1118_v42 }
  0xa5   : > { %v409_v43 = vpop.f32.mrf.mxu0 }
  0xa6   : > { %v410_v44 = vadd.f32 %v1402_v41, %v409_v43 }
  0xa8   : > { %v488_v46 = vmax.f32 %v410_v44, 0.0  ;;  %v1117_v44 = vld [vmem:[%s1632_s5 + $0x28] sm:$0xff] }
  0xa9   : > { %810 = vmatpush.bf16.msra.mxu2 %v1117_v44  ;;  %1133 = vmatpush.bf16.msra.mxu3 %v1117_v44 }
  0xaa   : > { %v519_v49 = vpack.c.bf16 %v488_v46, %v487_v45  ;;  %v1116_v45 = vld [vmem:[%s1632_s5 + $0x20] sm:$0xff] }
  0xac   : > { %611 = vmatmul.bf16.vlgmr.msra.gmra.mxu1 %v519_v49  ;;  %v1115_v49 = vld [vmem:[%s1632_s5 + $0x18] sm:$0xff] }
  0xad   : > { %v412_v51 = vpop.f32.mrf.mxu0  ;;  %811 = vmatpush.bf16.msra.mxu2 %v1116_v45  ;;  %1134 = vmatpush.bf16.msra.mxu3 %v1116_v45 }
  0xae   : > { %v413_v52 = vadd.f32 %v1402_v41, %v412_v51 }
  0xb0   : > { %1027 = vmatmul.msk.bf16.gmra.mxu0 %vm345_vm1, %v322_v50  ;;  %v489_v55 = vmax.f32 %v413_v52, 0.0 }
  0xb1   : > { %812 = vmatpush.bf16.msra.mxu2 %v1115_v49  ;;  %1135 = vmatpush.bf16.msra.mxu3 %v1115_v49 }
  0xb5   : > { %v414_v53 = vpop.f32.mrf.mxu0 }
  0xb6   : > { %v415_v54 = vadd.f32 %v1402_v41, %v414_v53  ;;  %v1114_v53 = vld [vmem:[%s1632_s5 + $0x10] sm:$0xff] }
  0xb7   : > { %813 = vmatpush.bf16.msra.mxu2 %v1114_v53  ;;  %1136 = vmatpush.bf16.msra.mxu3 %v1114_v53 }
  0xb8   : > { %v490_v56 = vmax.f32 %v415_v54, 0.0 }
  0xba   : > { %v520_v59 = vpack.c.bf16 %v490_v56, %v489_v55  ;;  %v1113_v55 = vld [vmem:[%s1632_s5 + $0x8] sm:$0xff]  ;;  %v1112_v56 = vld [vmem:[%s1632_s5] sm:$0xff] }
  0xbb   : > { %814 = vmatpush.bf16.msra.mxu2 %v1113_v55  ;;  %1137 = vmatpush.bf16.msra.mxu3 %v1113_v55 }
  0xbc   : > { %616 = vmatmul.bf16.gmra.mxu1 %v520_v59 }
  0xbd   : > { %v417_v61 = vpop.f32.mrf.mxu0 }
  0xbe   : > { %v418_v1 = vadd.f32 %v1402_v41, %v417_v61 }
  0xbf   : > { %815 = vmatpush.bf16.msra.mxu2 %v1112_v56  ;;  %1138 = vmatpush.bf16.msra.mxu3 %v1112_v56 }
  0xc0   : > { %1028 = vmatmul.msk.bf16.gmra.mxu0 %vm345_vm1, %v323_v60  ;;  %v491_v4 = vmax.f32 %v418_v1, 0.0 }
  0xc5   : > { %v419_v2 = vpop.f32.mrf.mxu0 }
  0xc6   : > { %v420_v3 = vadd.f32 %v1402_v41, %v419_v2 }
  0xc8   : > { %v492_v5 = vmax.f32 %v420_v3, 0.0 }
  0xca   : > { %v521_v8 = vpack.c.bf16 %v492_v5, %v491_v4 }
  0xcc   : > { %621 = vmatmul.bf16.gmra.mxu1 %v521_v8 }
  0xcd   : > { %v422_v10 = vpop.f32.mrf.mxu0 }
  0xce   : > { %v423_v14 = vadd.f32 %v1402_v41, %v422_v10 }
  0xd0   : > { %1029 = vmatmul.msk.bf16.gmra.mxu0 %vm345_vm1, %v324_v9  ;;  %v493_v17 = vmax.f32 %v423_v14, 0.0 }
  0xd5   : > { %v424_v15 = vpop.f32.mrf.mxu0 }
  0xd6   : > { %v425_v16 = vadd.f32 %v1402_v41, %v424_v15 }
  0xd8   : > { %v494_v18 = vmax.f32 %v425_v16, 0.0 }
  0xda   : > { %v522_v21 = vpack.c.bf16 %v494_v18, %v493_v17 }
  0xdc   : > { %626 = vmatmul.bf16.gmra.mxu1 %v522_v21 }
  0xdd   : > { %v427_v23 = vpop.f32.mrf.mxu0 }
  0xde   : > { %v428_v27 = vadd.f32 %v1402_v41, %v427_v23 }
  0xe0   : > { %1030 = vmatmul.msk.bf16.gmra.mxu0 %vm345_vm1, %v325_v22  ;;  %v495_v30 = vmax.f32 %v428_v27, 0.0 }
  0xe5   : > { %v429_v28 = vpop.f32.mrf.mxu0 }
  0xe6   : > { %v430_v29 = vadd.f32 %v1402_v41, %v429_v28 }
  0xe8   : > { %v496_v31 = vmax.f32 %v430_v29, 0.0 }
  0xea   : > { %v523_v32 = vpack.c.bf16 %v496_v31, %v495_v30 }
  0xec   : > { %631 = vmatmul.bf16.gmra.mxu1 %v523_v32 }
  0xed   : > { %v432_v33 = vpop.f32.mrf.mxu0 }
  0xee   : > { %v433_v34 = vadd.f32 %v1402_v41, %v432_v33 }
  0xf0   : > { %v497_v38 = vmax.f32 %v433_v34, 0.0 }
  0xf5   : > { %v434_v35 = vpop.f32.mrf.mxu0 }
  0xf6   : > { %v435_v36 = vadd.f32 %v1402_v41, %v434_v35 }
  0xf8   : > { %v498_v39 = vmax.f32 %v435_v36, 0.0 }
  0xfa   : > { %v524_v40 = vpack.c.bf16 %v498_v39, %v497_v38 }
  0xfc   : > { %636 = vmatmul.bf16.gmra.mxu1 %v524_v40 }
  0xfd   : > { %v437_v43 = vpop.f32.mrf.mxu0 }
  0xfe   : > { %v438_v46 = vadd.f32 %v1402_v41, %v437_v43 }
 0x100   : > { %v499_v50 = vmax.f32 %v438_v46, 0.0 }
 0x105   : > { %v439_v47 = vpop.f32.mrf.mxu0 }
 0x106   : > { %v440_v48 = vadd.f32 %v1402_v41, %v439_v47 }
 0x108   : > { %v500_v51 = vmax.f32 %v440_v48, 0.0 }
 0x10a   : > { %v525_v52 = vpack.c.bf16 %v500_v51, %v499_v50 }
 0x10c   : > { %641 = vmatmul.bf16.gmra.mxu1 %v525_v52  ;;  %v472_v52 = vpop.f32.mrf.mxu3 }
 0x10d   : > { %v442_v54 = vpop.f32.mrf.mxu0 }
 0x10e   : > { %v443_v57 = vadd.f32 %v1402_v41, %v442_v54 }
 0x110   : > { %v501_v60 = vmax.f32 %v443_v57, 0.0 }
 0x115   : > { %v444_v58 = vpop.f32.mrf.mxu0 }
 0x116   : > { %v445_v59 = vadd.f32 %v1402_v41, %v444_v58 }
 0x118   : > { %v502_v61 = vmax.f32 %v445_v59, 0.0 }
 0x11a   : > { %v526_v62 = vpack.c.bf16 %v502_v61, %v501_v60 }
 0x11c   : > { %646 = vmatmul.bf16.gmra.mxu1 %v526_v62  ;;  %v474_v62 = vpop.f32.mrf.mxu3 }
 0x11d   : > { %v447_v63 = vpop.f32.mrf.mxu0 }
 0x11e   : > { %v448_v0 = vadd.f32 %v1402_v41, %v447_v63 }
 0x120   : > { %v503_v3 = vmax.f32 %v448_v0, 0.0 }
 0x125   : > { %v449_v1 = vpop.f32.mrf.mxu0 }
 0x126   : > { %v450_v2 = vadd.f32 %v1402_v41, %v449_v1 }
 0x128   : > { %v504_v4 = vmax.f32 %v450_v2, 0.0 }
 0x129   : > { %v612_v5 = vpop.f32.mrf.mxu1 }
 0x12a   : > { %v527_v6 = vpack.c.bf16 %v504_v4, %v503_v3  ;;  %v613_v9 = vadd.f32 %v1471_v7, %v612_v5  ;;  %v477_v5 = vpop.f32.mrf.mxu3 }
 0x12c   : > { %651 = vmatmul.bf16.gmra.mxu1 %v527_v6  ;;  %v692_v12 = vmax.f32 %v613_v9, 0.0  ;;  %v473_v6 = vadd.f32 %v1402_v41, %v472_v52 }
 0x12d   : > { %v452_v8 = vpop.f32.mrf.mxu0 }
 0x12e   : > { %v453_v13 = vadd.f32 %v1402_v41, %v452_v8  ;;  %v475_v8 = vadd.f32 %v1402_v41, %v474_v62 }
 0x130   : > { %v505_v18 = vmax.f32 %v453_v13, 0.0  ;;  %v514_v13 = vmax.f32 %v475_v8, 0.0 }
 0x131   : > { %v614_v10 = vpop.f32.mrf.mxu1 }
 0x132   : > { %v615_v11 = vadd.f32 %v1471_v7, %v614_v10 }
 0x134   : > { %v693_v14 = vmax.f32 %v615_v11, 0.0 }
 0x135   : > { %v454_v15 = vpop.f32.mrf.mxu0 }
 0x136   : > { %v455_v16 = vadd.f32 %v1402_v41, %v454_v15  ;;  %v724_v17 = vpack.c.bf16 %v693_v14, %v692_v12  ;;  %v513_v12 = vmax.f32 %v473_v6, 0.0 }
 0x138   : > { %v506_v19 = vmax.f32 %v455_v16, 0.0  ;;  %816 = vmatmul.bf16.vlgmr.msra.gmra.mxu2 %v724_v17  ;;  %v532_v16 = vpack.c.bf16 %v514_v13, %v513_v12  ;;  %v479_v17 = vpop.f32.mrf.mxu3 }
 0x139   : > { %v617_v20 = vpop.f32.mrf.mxu1 }
 0x13a   : > { %v528_v21 = vpack.c.bf16 %v506_v19, %v505_v18  ;;  %v618_v23 = vadd.f32 %v1471_v7, %v617_v20  ;;  %v478_v20 = vadd.f32 %v1402_v41, %v477_v5 }
 0x13c   : > { %656 = vmatmul.bf16.gmra.mxu1 %v528_v21  ;;  %v694_v26 = vmax.f32 %v618_v23, 0.0  ;;  %v480_v21 = vadd.f32 %v1402_v41, %v479_v17 }
 0x13d   : > { %v457_v22 = vpop.f32.mrf.mxu0 }
 0x13e   : > { %v458_v27 = vadd.f32 %v1402_v41, %v457_v22 }
 0x140   : > { %v507_v32 = vmax.f32 %v458_v27, 0.0  ;;  %v516_v27 = vmax.f32 %v480_v21, 0.0 }
 0x141   : > { %v619_v24 = vpop.f32.mrf.mxu1 }
 0x142   : > { %v620_v25 = vadd.f32 %v1471_v7, %v619_v24 }
 0x144   : > { %v695_v28 = vmax.f32 %v620_v25, 0.0  ;;  %v482_v25 = vpop.f32.mrf.mxu3 }
 0x145   : > { %v459_v29 = vpop.f32.mrf.mxu0 }
 0x146   : > { %v460_v30 = vadd.f32 %v1402_v41, %v459_v29  ;;  %v725_v31 = vpack.c.bf16 %v695_v28, %v694_v26  ;;  %v515_v26 = vmax.f32 %v478_v20, 0.0 }
 0x148   : > { %v508_v33 = vmax.f32 %v460_v30, 0.0  ;;  %821 = vmatmul.bf16.gmra.mxu2 %v725_v31  ;;  %v533_v30 = vpack.c.bf16 %v516_v27, %v515_v26 }
 0x149   : > { %v622_v34 = vpop.f32.mrf.mxu1 }
 0x14a   : > { %v529_v35 = vpack.c.bf16 %v508_v33, %v507_v32  ;;  %v623_v37 = vadd.f32 %v1471_v7, %v622_v34  ;;  %v483_v34 = vadd.f32 %v1402_v41, %v482_v25 }
 0x14c   : > { %661 = vmatmul.bf16.gmra.mxu1 %v529_v35  ;;  %v696_v40 = vmax.f32 %v623_v37, 0.0  ;;  %v484_v31 = vpop.f32.mrf.mxu3 }
 0x14d   : > { %v462_v36 = vpop.f32.mrf.mxu0  ;;  %v485_v35 = vadd.f32 %v1402_v41, %v484_v31 }
 0x14e   : > { %v463_v42 = vadd.f32 %v1402_v41, %v462_v36 }
 0x150   : > { %v509_v47 = vmax.f32 %v463_v42, 0.0 }
 0x151   : > { %v624_v38 = vpop.f32.mrf.mxu1 }
 0x152   : > { %v625_v39 = vadd.f32 %v1471_v7, %v624_v38 }
 0x154   : > { %v697_v43 = vmax.f32 %v625_v39, 0.0  ;;  %v517_v39 = vmax.f32 %v483_v34, 0.0 }
 0x155   : > { %v464_v44 = vpop.f32.mrf.mxu0 }
 0x156   : > { %v465_v45 = vadd.f32 %v1402_v41, %v464_v44  ;;  %v726_v46 = vpack.c.bf16 %v697_v43, %v696_v40  ;;  %v518_v40 = vmax.f32 %v485_v35, 0.0 }
 0x158   : > { %v510_v48 = vmax.f32 %v465_v45, 0.0  ;;  %826 = vmatmul.bf16.gmra.mxu2 %v726_v46  ;;  %v534_v44 = vpack.c.bf16 %v518_v40, %v517_v39 }
 0x159   : > { %v627_v49 = vpop.f32.mrf.mxu1 }
 0x15a   : > { %v530_v50 = vpack.c.bf16 %v510_v48, %v509_v47  ;;  %v628_v53 = vadd.f32 %v1471_v7, %v627_v49 }
 0x15c   : > { %666 = vmatmul.bf16.gmra.mxu1 %v530_v50  ;;  %v698_v56 = vmax.f32 %v628_v53, 0.0 }
 0x15d   : > { %v467_v51 = vpop.f32.mrf.mxu0 }
 0x15e   : > { %v468_v57 = vadd.f32 %v1402_v41, %v467_v51 }
 0x160   : > { %v511_v63 = vmax.f32 %v468_v57, 0.0  ;;  %v1511_v57 = vld [vmem:[%s1633_s6] ss:$0 sm:$0xff] }
 0x161   : > { %v629_v54 = vpop.f32.mrf.mxu1 }
 0x162   : > { %v630_v55 = vadd.f32 %v1471_v7, %v629_v54 }
 0x164   : > { %v699_v58 = vmax.f32 %v630_v55, 0.0 }
 0x165   : > { %v469_v59 = vpop.f32.mrf.mxu0 }
 0x166   : > { %v470_v60 = vadd.f32 %v1402_v41, %v469_v59  ;;  %v727_v61 = vpack.c.bf16 %v699_v58, %v698_v56 }
 0x168   : > { %v512_v0 = vmax.f32 %v470_v60, 0.0  ;;  %831 = vmatmul.bf16.gmra.mxu2 %v727_v61 }
 0x169   : > { %v632_v1 = vpop.f32.mrf.mxu1 }
 0x16a   : > { %v531_v2 = vpack.c.bf16 %v512_v0, %v511_v63  ;;  %v633_v3 = vadd.f32 %v1471_v7, %v632_v1 }
 0x16c   : > { %671 = vmatmul.bf16.vlgmr.msrb.gmra.mxu3 %v531_v2  ;;  %v700_v10 = vmax.f32 %v633_v3, 0.0 }
 0x171   : > { %v634_v4 = vpop.f32.mrf.mxu1 }
 0x172   : > { %v635_v9 = vadd.f32 %v1471_v7, %v634_v4 }
 0x174   : > { %v701_v11 = vmax.f32 %v635_v9, 0.0 }
 0x176   : > { %v728_v14 = vpack.c.bf16 %v701_v11, %v700_v10 }
 0x178   : > { %836 = vmatmul.bf16.gmra.mxu2 %v728_v14 }
 0x179   : > { %v637_v15 = vpop.f32.mrf.mxu1 }
 0x17a   : > { %v638_v18 = vadd.f32 %v1471_v7, %v637_v15 }
 0x17c   : > { %676 = vmatmul.bf16.gmra.mxu3 %v532_v16  ;;  %v702_v23 = vmax.f32 %v638_v18, 0.0 }
 0x181   : > { %v639_v19 = vpop.f32.mrf.mxu1 }
 0x182   : > { %v640_v22 = vadd.f32 %v1471_v7, %v639_v19 }
 0x184   : > { %v703_v24 = vmax.f32 %v640_v22, 0.0 }
 0x186   : > { %v729_v28 = vpack.c.bf16 %v703_v24, %v702_v23 }
 0x188   : > { %841 = vmatmul.bf16.gmra.mxu2 %v729_v28 }
 0x189   : > { %v642_v29 = vpop.f32.mrf.mxu1 }
 0x18a   : > { %v643_v32 = vadd.f32 %v1471_v7, %v642_v29 }
 0x18c   : > { %681 = vmatmul.bf16.gmra.mxu3 %v533_v30  ;;  %v704_v37 = vmax.f32 %v643_v32, 0.0 }
 0x191   : > { %v644_v33 = vpop.f32.mrf.mxu1 }
 0x192   : > { %v645_v36 = vadd.f32 %v1471_v7, %v644_v33 }
 0x194   : > { %v705_v38 = vmax.f32 %v645_v36, 0.0 }
 0x196   : > { %v730_v42 = vpack.c.bf16 %v705_v38, %v704_v37 }
 0x198   : > { %846 = vmatmul.bf16.gmra.mxu2 %v730_v42 }
 0x199   : > { %v647_v43 = vpop.f32.mrf.mxu1 }
 0x19a   : > { %v648_v45 = vadd.f32 %v1471_v7, %v647_v43 }
 0x19c   : > { %686 = vmatmul.bf16.gmra.mxu3 %v534_v44  ;;  %v706_v48 = vmax.f32 %v648_v45, 0.0 }
 0x1a1   : > { %v649_v46 = vpop.f32.mrf.mxu1 }
 0x1a2   : > { %v650_v47 = vadd.f32 %v1471_v7, %v649_v46 }
 0x1a4   : > { %v707_v41 = vmax.f32 %v650_v47, 0.0 }
 0x1a6   : > { %v731_v49 = vpack.c.bf16 %v707_v41, %v706_v48 }
 0x1a8   : > { %851 = vmatmul.bf16.gmra.mxu2 %v731_v49 }
 0x1a9   : > { %v652_v50 = vpop.f32.mrf.mxu1 }
 0x1aa   : > { %v653_v51 = vadd.f32 %v1471_v7, %v652_v50 }
 0x1ac   : > { %v708_v54 = vmax.f32 %v653_v51, 0.0 }
 0x1b1   : > { %v654_v52 = vpop.f32.mrf.mxu1 }
 0x1b2   : > { %v655_v53 = vadd.f32 %v1471_v7, %v654_v52 }
 0x1b4   : > { %v709_v55 = vmax.f32 %v655_v53, 0.0 }
 0x1b6   : > { %v732_v56 = vpack.c.bf16 %v709_v55, %v708_v54 }
 0x1b8   : > { %856 = vmatmul.bf16.gmra.mxu2 %v732_v56 }
 0x1b9   : > { %v657_v58 = vpop.f32.mrf.mxu1 }
 0x1ba   : > { %v658_v61 = vadd.f32 %v1471_v7, %v657_v58 }
 0x1bb   : > { %v817_v59 = vpop.f32.mrf.mxu2 }
 0x1bc   : > { %v818_v60 = vadd.f32 %v1511_v57, %v817_v59  ;;  %v710_v1 = vmax.f32 %v658_v61, 0.0 }
 0x1be   : > { %897 = vst [vmem:[%s1514_s20] sm:$0xff] %v818_v60 }
 0x1c1   : > { %v659_v62 = vpop.f32.mrf.mxu1 }
 0x1c2   : > { %v660_v63 = vadd.f32 %v1471_v7, %v659_v62 }
 0x1c3   : > { %v819_v0 = vpop.f32.mrf.mxu2 }
 0x1c4   : > { %v711_v2 = vmax.f32 %v660_v63, 0.0  ;;  %v820_v3 = vadd.f32 %v1511_v57, %v819_v0 }
 0x1c6   : > { %898 = vst [vmem:[%s1514_s20 + $0x8] sm:$0xff] %v820_v3  ;;  %v733_v4 = vpack.c.bf16 %v711_v2, %v710_v1 }
 0x1c8   : > { %861 = vmatmul.bf16.gmra.mxu2 %v733_v4 }
 0x1c9   : > { %v662_v5 = vpop.f32.mrf.mxu1 }
 0x1ca   : > { %v663_v9 = vadd.f32 %v1471_v7, %v662_v5 }
 0x1cb   : > { %v822_v6 = vpop.f32.mrf.mxu2 }
 0x1cc   : > { %v823_v8 = vadd.f32 %v1511_v57, %v822_v6  ;;  %v712_v13 = vmax.f32 %v663_v9, 0.0 }
 0x1ce   : > { %899 = vst [vmem:[%s1514_s20 + $0x10] sm:$0xff] %v823_v8 }
 0x1d1   : > { %v664_v10 = vpop.f32.mrf.mxu1 }
 0x1d2   : > { %v665_v11 = vadd.f32 %v1471_v7, %v664_v10 }
 0x1d3   : > { %v824_v12 = vpop.f32.mrf.mxu2 }
 0x1d4   : > { %v713_v14 = vmax.f32 %v665_v11, 0.0  ;;  %v825_v15 = vadd.f32 %v1511_v57, %v824_v12 }
 0x1d6   : > { %900 = vst [vmem:[%s1514_s20 + $0x18] sm:$0xff] %v825_v15  ;;  %v734_v16 = vpack.c.bf16 %v713_v14, %v712_v13 }
 0x1d8   : > { %866 = vmatmul.bf16.gmra.mxu2 %v734_v16 }
 0x1d9   : > { %v667_v17 = vpop.f32.mrf.mxu1 }
 0x1da   : > { %v668_v20 = vadd.f32 %v1471_v7, %v667_v17 }
 0x1db   : > { %v827_v18 = vpop.f32.mrf.mxu2 }
 0x1dc   : > { %v828_v19 = vadd.f32 %v1511_v57, %v827_v18  ;;  %v714_v24 = vmax.f32 %v668_v20, 0.0 }
 0x1de   : > { %901 = vst [vmem:[%s1514_s20 + $0x20] sm:$0xff] %v828_v19 }
 0x1e1   : > { %v669_v21 = vpop.f32.mrf.mxu1 }
 0x1e2   : > { %v670_v22 = vadd.f32 %v1471_v7, %v669_v21 }
 0x1e3   : > { %v829_v23 = vpop.f32.mrf.mxu2 }
 0x1e4   : > { %v715_v25 = vmax.f32 %v670_v22, 0.0  ;;  %v830_v26 = vadd.f32 %v1511_v57, %v829_v23 }
 0x1e6   : > { %902 = vst [vmem:[%s1514_s20 + $0x28] sm:$0xff] %v830_v26  ;;  %v735_v27 = vpack.c.bf16 %v715_v25, %v714_v24 }
 0x1e8   : > { %871 = vmatmul.bf16.gmra.mxu2 %v735_v27 }
 0x1eb   : > { %v832_v28 = vpop.f32.mrf.mxu2 }
 0x1ec   : > { %v833_v29 = vadd.f32 %v1511_v57, %v832_v28 }
 0x1ee   : > { %903 = vst [vmem:[%s1514_s20 + $0x30] sm:$0xff] %v833_v29 }
 0x1ef   : > { %v672_v30 = vpop.f32.mrf.mxu3 }
 0x1f0   : > { %v673_v33 = vadd.f32 %v1471_v7, %v672_v30 }
 0x1f2   : > { %v716_v36 = vmax.f32 %v673_v33, 0.0 }
 0x1f3   : > { %v834_v31 = vpop.f32.mrf.mxu2 }
 0x1f4   : > { %v835_v32 = vadd.f32 %v1511_v57, %v834_v31 }
 0x1f6   : > { %904 = vst [vmem:[%s1514_s20 + $0x38] sm:$0xff] %v835_v32 }
 0x1f7   : > { %v674_v34 = vpop.f32.mrf.mxu3 }
 0x1f8   : > { %v675_v35 = vadd.f32 %v1471_v7, %v674_v34 }
 0x1fa   : > { %v717_v37 = vmax.f32 %v675_v35, 0.0 }
 0x1fb   : > { %v837_v38 = vpop.f32.mrf.mxu2 }
 0x1fc   : > { %v736_v39 = vpack.c.bf16 %v717_v37, %v716_v36  ;;  %v838_v40 = vadd.f32 %v1511_v57, %v837_v38 }
 0x1fe   : > { %905 = vst [vmem:[%s1514_s20 + $0x40] sm:$0xff] %v838_v40  ;;  %876 = vmatmul.bf16.vlgmr.msra.gmra.mxu3 %v736_v39 }
 0x1ff   : > { %v677_v42 = vpop.f32.mrf.mxu3 }
 0x200   : > { %v678_v45 = vadd.f32 %v1471_v7, %v677_v42 }
 0x202   : > { %v718_v48 = vmax.f32 %v678_v45, 0.0 }
 0x203   : > { %v839_v43 = vpop.f32.mrf.mxu2 }
 0x204   : > { %v840_v44 = vadd.f32 %v1511_v57, %v839_v43 }
 0x206   : > { %906 = vst [vmem:[%s1514_s20 + $0x48] sm:$0xff] %v840_v44 }
 0x207   : > { %v679_v46 = vpop.f32.mrf.mxu3 }
 0x208   : > { %v680_v47 = vadd.f32 %v1471_v7, %v679_v46 }
 0x20a   : > { %v719_v41 = vmax.f32 %v680_v47, 0.0 }
 0x20b   : > { %v842_v49 = vpop.f32.mrf.mxu2 }
 0x20c   : > { %v843_v50 = vadd.f32 %v1511_v57, %v842_v49  ;;  %v737_v51 = vpack.c.bf16 %v719_v41, %v718_v48 }
 0x20e   : > { %907 = vst [vmem:[%s1514_s20 + $0x50] sm:$0xff] %v843_v50  ;;  %881 = vmatmul.bf16.gmra.mxu3 %v737_v51 }
 0x20f   : > { %v682_v52 = vpop.f32.mrf.mxu3 }
 0x210   : > { %v683_v55 = vadd.f32 %v1471_v7, %v682_v52 }
 0x212   : > { %v720_v59 = vmax.f32 %v683_v55, 0.0 }
 0x213   : > { %v844_v53 = vpop.f32.mrf.mxu2 }
 0x214   : > { %v845_v54 = vadd.f32 %v1511_v57, %v844_v53 }
 0x216   : > { %908 = vst [vmem:[%s1514_s20 + $0x58] sm:$0xff] %v845_v54 }
 0x217   : > { %v684_v56 = vpop.f32.mrf.mxu3 }
 0x218   : > { %v685_v58 = vadd.f32 %v1471_v7, %v684_v56 }
 0x21a   : > { %v721_v60 = vmax.f32 %v685_v58, 0.0 }
 0x21b   : > { %v847_v61 = vpop.f32.mrf.mxu2 }
 0x21c   : > { %v848_v62 = vadd.f32 %v1511_v57, %v847_v61  ;;  %v738_v63 = vpack.c.bf16 %v721_v60, %v720_v59 }
 0x21e   : > { %909 = vst [vmem:[%s1514_s20 + $0x60] sm:$0xff] %v848_v62  ;;  %886 = vmatmul.bf16.gmra.mxu3 %v738_v63 }
 0x21f   : > { %v687_v0 = vpop.f32.mrf.mxu3 }
 0x220   : > { %v688_v3 = vadd.f32 %v1471_v7, %v687_v0 }
 0x222   : > { %v722_v6 = vmax.f32 %v688_v3, 0.0 }
 0x223   : > { %v849_v1 = vpop.f32.mrf.mxu2 }
 0x224   : > { %v850_v2 = vadd.f32 %v1511_v57, %v849_v1 }
 0x226   : > { %910 = vst [vmem:[%s1514_s20 + $0x68] sm:$0xff] %v850_v2 }
 0x227   : > { %v689_v4 = vpop.f32.mrf.mxu3 }
 0x228   : > { %v690_v5 = vadd.f32 %v1471_v7, %v689_v4 }
 0x22a   : > { %v723_v8 = vmax.f32 %v690_v5, 0.0 }
 0x22b   : > { %v852_v9 = vpop.f32.mrf.mxu2 }
 0x22c   : > { %v853_v10 = vadd.f32 %v1511_v57, %v852_v9  ;;  %v739_v11 = vpack.c.bf16 %v723_v8, %v722_v6 }
 0x22e   : > { %911 = vst [vmem:[%s1514_s20 + $0x70] sm:$0xff] %v853_v10  ;;  %891 = vmatmul.bf16.gmra.mxu3 %v739_v11 }
 0x233   : > { %v854_v12 = vpop.f32.mrf.mxu2 }
 0x234   : > { %v855_v13 = vadd.f32 %v1511_v57, %v854_v12 }
 0x236   : > { %912 = vst [vmem:[%s1514_s20 + $0x78] sm:$0xff] %v855_v13 }
 0x23b   : > { %v857_v14 = vpop.f32.mrf.mxu2 }
 0x23c   : > { %v858_v15 = vadd.f32 %v1511_v57, %v857_v14 }
 0x23e   : > { %913 = vst [vmem:[%s1514_s20 + $0x80] sm:$0xff] %v858_v15 }
 0x243   : > { %v859_v7 = vpop.f32.mrf.mxu2 }
 0x244   : > { %v860_v16 = vadd.f32 %v1511_v57, %v859_v7 }
 0x246   : > { %914 = vst [vmem:[%s1514_s20 + $0x88] sm:$0xff] %v860_v16 }
 0x24b   : > { %v862_v17 = vpop.f32.mrf.mxu2 }
 0x24c   : > { %v863_v18 = vadd.f32 %v1511_v57, %v862_v17 }
 0x24e   : > { %915 = vst [vmem:[%s1514_s20 + $0x90] sm:$0xff] %v863_v18 }
 0x253   : > { %v864_v19 = vpop.f32.mrf.mxu2 }
 0x254   : > { %v865_v20 = vadd.f32 %v1511_v57, %v864_v19 }
 0x256   : > { %916 = vst [vmem:[%s1514_s20 + $0x98] sm:$0xff] %v865_v20 }
 0x25b   : > { %v867_v21 = vpop.f32.mrf.mxu2 }
 0x25c   : > { %v868_v22 = vadd.f32 %v1511_v57, %v867_v21 }
 0x25e   : > { %917 = vst [vmem:[%s1514_s20 + $0xa0] sm:$0xff] %v868_v22 }
 0x263   : > { %v869_v23 = vpop.f32.mrf.mxu2 }
 0x264   : > { %v870_v24 = vadd.f32 %v1511_v57, %v869_v23 }
 0x266   : > { %918 = vst [vmem:[%s1514_s20 + $0xa8] sm:$0xff] %v870_v24 }
 0x26b   : > { %v872_v25 = vpop.f32.mrf.mxu2 }
 0x26c   : > { %v873_v26 = vadd.f32 %v1511_v57, %v872_v25 }
 0x26e   : > { %919 = vst [vmem:[%s1514_s20 + $0xb0] sm:$0xff] %v873_v26 }
 0x273   : > { %v874_v27 = vpop.f32.mrf.mxu2 }
 0x274   : > { %v875_v28 = vadd.f32 %v1511_v57, %v874_v27 }
 0x276   : > { %920 = vst [vmem:[%s1514_s20 + $0xb8] sm:$0xff] %v875_v28 }
 0x281   : > { %v877_v29 = vpop.f32.mrf.mxu3 }
 0x282   : > { %v878_v30 = vadd.f32 %v1511_v57, %v877_v29 }
 0x284   : > { %921 = vst [vmem:[%s1514_s20 + $0xc0] sm:$0xff] %v878_v30 }
 0x289   : > { %v879_v31 = vpop.f32.mrf.mxu3 }
 0x28a   : > { %v880_v32 = vadd.f32 %v1511_v57, %v879_v31 }
 0x28c   : > { %922 = vst [vmem:[%s1514_s20 + $0xc8] sm:$0xff] %v880_v32 }
 0x291   : > { %v882_v33 = vpop.f32.mrf.mxu3 }
 0x292   : > { %v883_v34 = vadd.f32 %v1511_v57, %v882_v33 }
 0x294   : > { %923 = vst [vmem:[%s1514_s20 + $0xd0] sm:$0xff] %v883_v34 }
 0x299   : > { %v884_v35 = vpop.f32.mrf.mxu3 }
 0x29a   : > { %v885_v36 = vadd.f32 %v1511_v57, %v884_v35 }
 0x29c   : > { %924 = vst [vmem:[%s1514_s20 + $0xd8] sm:$0xff] %v885_v36 }
 0x2a1   : > { %v887_v37 = vpop.f32.mrf.mxu3 }
 0x2a2   : > { %v888_v38 = vadd.f32 %v1511_v57, %v887_v37 }
 0x2a4   : > { %925 = vst [vmem:[%s1514_s20 + $0xe0] sm:$0xff] %v888_v38 }
 0x2a9   : > { %v889_v39 = vpop.f32.mrf.mxu3 }
 0x2aa   : > { %v890_v40 = vadd.f32 %v1511_v57, %v889_v39 }
 0x2ac   : > { %926 = vst [vmem:[%s1514_s20 + $0xe8] sm:$0xff] %v890_v40 }
 0x2b1   : > { %v892_v42 = vpop.f32.mrf.mxu3 }
 0x2b2   : > { %v893_v43 = vadd.f32 %v1511_v57, %v892_v42 }
 0x2b4   : > { %927 = vst [vmem:[%s1514_s20 + $0xf0] sm:$0xff] %v893_v43 }
 0x2b9   : > { %v894_v44 = vpop.f32.mrf.mxu3 }
 0x2ba   : > { %v895_v45 = vadd.f32 %v1511_v57, %v894_v44 }
 0x2bc   : > { %928 = vst [vmem:[%s1514_s20 + $0xf8] sm:$0xff] %v895_v45 }
 0x2bd   : > { %1210 = shalt.err (!%p1207_p3)
}
 0x2be   : > { %s1247_s16 = smov 128   ;;  %s1248_s20 = smov 8  }
 0x2bf   : > { %1139 = dma.vmem_to_hbm [thread:$0]  (%p1327_p5), %s943_s9, 4096, %s945_s21, %s930_s13, %s1247_s16, %s1247_s16, %s1248_s20  }
 0x2c0 PF: > { %p1145_p4 = scmp.ge.s32.totalorder %s1245_s27, 2  ;;  %s959_s23 = sand.u32 1, %s1233_s24  }
 0x2c1   : > { %s960_s29 = scalar_lea.sflag [#allocation3], %s959_s23 }
 0x2c2   : > { %p1142_p7 = pnand %p1145_p4, %p1331_p6 }
 0x2c4   : > { %p1143_p8 = pneg %p1142_p7 }
 0x2c6   : > { %1228 = dma.done.wait (%p1143_p8), %s960_s29, 4096  }
 0x2c7   : > { %1230 = vsyncadd (%p1143_p8), %s960_s29, 4294963200  ;;  %p17_p9 = scmp.ge.s32.totalorder %s1314_s30, 4   ;;  %s1637_s24 = smov %s1237_s25 }
 0x2c8   : > { %s1638_s25 = smov %s1241_s26  ;;  %s1639_s26 = smov %s1325_s10 }
 0x2c9   : > { %s1640_s27 = smov %s1314_s30  ;;  %19 = sbr.rel (!%p17_p9) target bundleno = 3 (0x3), region = 83 }
 0x2ce   :  { %966 = vsyncpa [#allocation3], 1 }
 0x2cf   :  { %968 = vsyncpa [#allocation3 + $0x1], 1 }

</bundles_post_ra>
